<compile_context>
chip_gen: v6e
topology: v6e:2x2x1
jax: 0.10.0
libtpu: 0.0.40
codegen_flags: <defaults>
</compile_context>

<pallas_src>
import functools
from typing import NamedTuple

import jax
import jax.numpy as jnp
from jax.experimental import pallas as pl
from jax.experimental.pallas import tpu as pltpu


# ----------------------------------------------------------------------------
# Kernels
# ----------------------------------------------------------------------------
def _resblock_kernel_resident(x_ref, w1_ref, b1_ref, w2_ref, b2_ref, o_ref):
    """Both (H, H) weight matrices are VMEM-resident; grid = (batch tiles,)."""
    x = x_ref[...]                                                # (tb, H)
    h = jnp.dot(x.astype(w1_ref.dtype), w1_ref[...],
                preferred_element_type=jnp.float32)               # fc1 (MXU)
    h = jnp.maximum(h + b1_ref[...], 0.0)                         # bias + ReLU
    y = jnp.dot(h.astype(w2_ref.dtype), w2_ref[...],
                preferred_element_type=jnp.float32)               # fc2 (MXU)
    y = y + b2_ref[...] + x.astype(jnp.float32)                   # bias + residual
    o_ref[...] = jnp.maximum(y, 0.0).astype(o_ref.dtype)          # final ReLU


def _resblock_kernel_streamed(x_ref, w1_ref, b1_ref, w2_ref, b2_ref, o_ref,
                              *scratch, acc_in_out: bool, cast_x: bool):
    """k-streamed variant for very large H; grid = (batch tiles, k chunks).

    k chunks the fc1-output / fc2-contraction dimension.  Partial fc2 products
    are accumulated in f32 — directly in o_ref when the output dtype is f32
    (no scratch, saves a (tb, H) store+load pass), otherwise in a f32 scratch.
    """
    k = pl.program_id(1)
    i = 0
    if cast_x:
        xcast_ref = scratch[i]
        i += 1
    acc_ref = o_ref if acc_in_out else scratch[i]

    if cast_x:
        # Hoisted cast: convert x to the matmul dtype once per batch tile,
        # not once per k step (removes a repeated (tb,H) VPU convert).
        @pl.when(k == 0)
        def _():
            xcast_ref[...] = x_ref[...].astype(xcast_ref.dtype)
        x_mm = xcast_ref[...]
    else:
        x_mm = x_ref[...]

    # fc1 chunk: (tb, H) @ (H, tk), bias + ReLU in f32.
    h = jnp.dot(x_mm, w1_ref[...], preferred_element_type=jnp.float32)
    h = jnp.maximum(h + b1_ref[...], 0.0)
    # fc2 partial: (tb, tk) @ (tk, H), f32 accumulation.
    part = jnp.dot(h.astype(w2_ref.dtype), w2_ref[...],
                   preferred_element_type=jnp.float32)

    @pl.when(k == 0)
    def _():
        acc_ref[...] = part.astype(acc_ref.dtype)     # first chunk: write, not +=

    @pl.when(k > 0)
    def _():
        acc_ref[...] += part.astype(acc_ref.dtype)

    @pl.when(k == pl.num_programs(1) - 1)
    def _():
        y = (acc_ref[...].astype(jnp.float32) + b2_ref[...]
             + x_ref[...].astype(jnp.float32))        # bias + residual (f32)
        o_ref[...] = jnp.maximum(y, 0.0).astype(o_ref.dtype)


# ----------------------------------------------------------------------------
# Configuration helpers (run eagerly, outside jit)
# ----------------------------------------------------------------------------
def _round_up(n, m):
    return -(-n // m) * m


def _tile_bytes(rows, cols, itemsize):
    """VMEM bytes of one (rows, cols) tile including (8, 128) layout padding."""
    return _round_up(rows, 8) * _round_up(cols, 128) * itemsize


@functools.lru_cache(maxsize=None)
def _vmem_capacity_bytes():
    """Physical VMEM per TensorCore; conservative 64 MiB (v7x) fallback."""
    try:
        return int(pltpu.get_tpu_info().vmem_capacity_bytes)
    except Exception:
        return 64 << 20


def _probe_kernel(x_ref, b_ref, o_ref):
    o_ref[...] = x_ref[...] + b_ref[...]


@functools.lru_cache(maxsize=None)
def _single_buffer_supported():
    """Probe whether this jax/Mosaic build accepts pipeline_mode=pl.Buffered(1)
    (used to single-buffer constant-index resident weights/biases)."""
    try:
        fn = pl.pallas_call(
            _probe_kernel,
            out_shape=jax.ShapeDtypeStruct((8, 128), jnp.float32),
            grid_spec=pltpu.PrefetchScalarGridSpec(
                num_scalar_prefetch=0,
                grid=(2,),
                in_specs=[
                    pl.BlockSpec((8, 128), lambda i: (0, 0),
                                 pipeline_mode=pl.Buffered(1)),
                    pl.BlockSpec((1, 128), lambda i: (0, 0),
                                 pipeline_mode=pl.Buffered(1)),
                ],
                out_specs=pl.BlockSpec((8, 128), lambda i: (0, 0)),
            ),
        )
        out = jax.block_until_ready(
            fn(jnp.zeros((8, 128), jnp.float32), jnp.ones((1, 128), jnp.float32)))
        return bool(jnp.all(out == 1.0))
    except Exception:
        return False


def _spec(block_shape, index_map, *, single_buffer=False):
    """BlockSpec; single_buffer requests 1-deep buffering (constant-index block)."""
    if single_buffer:
        return pl.BlockSpec(block_shape, index_map, pipeline_mode=pl.Buffered(1))
    return pl.BlockSpec(block_shape, index_map)


class _Config(NamedTuple):
    block_batch: int
    block_k: int          # 0 => weights fully resident (no k streaming)
    acc_in_out: bool
    cast_x: bool
    single_buffer: bool
    vmem_limit: int


def _resident_need(bb, H, xb, ob, wb, single_buffer):
    wbuf = 1 if single_buffer else 2
    return (2 * _tile_bytes(bb, H, xb)              # x tiles (double-buffered)
            + 2 * _tile_bytes(bb, H, ob)            # out tiles (double-buffered)
            + 2 * wbuf * _tile_bytes(H, H, wb)      # W1 + W2 (resident)
            + 2 * wbuf * _tile_bytes(1, H, 4))      # b1 + b2 (incl. sublane pad)


def _streamed_need(bb, bk, H, xb, ob, wb, acc_in_out, cast_x, single_buffer):
    b2buf = 1 if single_buffer else 2
    need = (2 * _tile_bytes(bb, H, xb)
            + 2 * _tile_bytes(bb, H, ob)
            + 2 * _tile_bytes(H, bk, wb)            # W1 slab (double-buffered)
            + 2 * _tile_bytes(bk, H, wb)            # W2 slab (double-buffered)
            + 2 * _tile_bytes(1, bk, 4)             # b1 chunk
            + b2buf * _tile_bytes(1, H, 4))         # b2 (constant index)
    if not acc_in_out:
        need += _tile_bytes(bb, H, 4)               # f32 accumulator scratch
    if cast_x:
        need += _tile_bytes(bb, H, wb)              # cast-once x scratch
    return need


def _largest_aligned_divisor(n, cap, align):
    t = min(cap, n) // align * align
    while t >= align:
        if n % t == 0:
            return t
        t -= align
    return 0


def _choose_config(B, H, x_dtype, w_dtype, out_dtype, block_batch, block_k):
    if block_k is not None and H % block_k != 0:
        raise ValueError(f"block_k={block_k} must divide the hidden dim H={H}")

    xb = jnp.dtype(x_dtype).itemsize
    ob = jnp.dtype(out_dtype).itemsize
    wb = jnp.dtype(w_dtype).itemsize

    cap = _vmem_capacity_bytes()
    cap_limit = cap * 7 // 8                 # never request more than 7/8 of VMEM
    budget = cap_limit - (6 << 20)           # headroom for Mosaic internal scratch

    single_buffer = _single_buffer_supported()
    acc_in_out = jnp.dtype(out_dtype) == jnp.dtype(jnp.float32)
    cast_x = jnp.dtype(x_dtype) != jnp.dtype(w_dtype)

    # Batch-tile candidates: 256 rows keeps the 2x256^2 MXUs (v6e/v7x) full, is
    # 128-aligned for v5e, and gives >=2 megacore-shardable steps for B >= 512.
    if block_batch is not None:
        res_bbs = [int(block_batch)]
    elif B <= 256:
        res_bbs = [B]
    else:
        res_bbs = [256, 128]

    stream = block_k is not None
    bb = None
    if not stream:
        for c in res_bbs:
            if _resident_need(c, H, xb, ob, wb, single_buffer) <= budget:
                bb = c
                break
        stream = bb is None

    bk = 0
    if stream:
        bk = int(block_k) if block_k is not None else (
            _largest_aligned_divisor(H, 1024, 256)
            or _largest_aligned_divisor(H, 1024, 128))
        if bk == 0:
            # Awkward H with no 128-aligned divisor: keep weights resident.
            # TODO(synk): pad H (W1 cols / W2 rows / b1) instead of risking a
            # VMEM overshoot for very large awkward hidden dims.
            stream = False
            bb = res_bbs[-1]
        elif block_batch is not None:
            bb = int(block_batch)
        else:
            # When streaming, weight HBM traffic scales with the number of
            # batch tiles -> use the largest batch tile that fits the budget.
            cands = [c for c in (1024, 512, 256, 128) if c <= B] or [B]
            bb = cands[-1]
            for c in cands:
                if _streamed_need(c, bk, H, xb, ob, wb,
                                  acc_in_out, cast_x, single_buffer) <= budget:
                    bb = c
                    break

    if stream:
        need = _streamed_need(bb, bk, H, xb, ob, wb, acc_in_out, cast_x, single_buffer)
    else:
        need = _resident_need(bb, H, xb, ob, wb, single_buffer)
    vmem_limit = int(min(max(int(need * 1.3) + (2 << 20), 32 << 20), cap_limit))

    return _Config(block_batch=int(bb), block_k=int(bk),
                   acc_in_out=bool(acc_in_out), cast_x=bool(cast_x),
                   single_buffer=bool(single_buffer), vmem_limit=int(vmem_limit))


# ----------------------------------------------------------------------------
# Public API
# ----------------------------------------------------------------------------
def prepare_resblock_params(w1, b1, w2, b2, matmul_dtype=None):
    """One-time layout glue (keep OUT of the per-call hot path).

    PyTorch (out, in) weights -> (in, out); biases -> (1, H) f32.  Pass
    matmul_dtype=jnp.bfloat16 to store weights in bf16 (MXU-native, halves
    weight DMA / VMEM); accumulation, bias and residual math stay f32.
    """
    wdt = matmul_dtype if matmul_dtype is not None else jnp.asarray(w1).dtype
    return (jnp.asarray(w1).T.astype(wdt),
            jnp.asarray(b1).reshape(1, -1).astype(jnp.float32),
            jnp.asarray(w2).T.astype(wdt),
            jnp.asarray(b2).reshape(1, -1).astype(jnp.float32))


@functools.partial(jax.jit, static_argnames=("cfg",))
def _residual_block_impl(x, w1_t, b1_2d, w2_t, b2_2d, *, cfg):
    B, H = x.shape
    bb, bk = cfg.block_batch, cfg.block_k

    # Pad awkward batch sizes to the MXU-aligned tile instead of using huge tiles.
    B_pad = _round_up(B, bb)
    x_in = x if B_pad == B else jnp.pad(x, ((0, B_pad - B), (0, 0)))
    nb = B_pad // bb

    xb = x.dtype.itemsize
    wb = w1_t.dtype.itemsize

    if bk == 0:
        # Fully-resident weights: fetched from HBM exactly once per call and
        # single-buffered (constant block index) when supported.
        grid = (nb,)
        kernel = _resblock_kernel_resident
        in_specs = [
            _spec((bb, H), lambda i: (i, 0)),                                   # x
            _spec((H, H), lambda i: (0, 0), single_buffer=cfg.single_buffer),   # W1^T
            _spec((1, H), lambda i: (0, 0), single_buffer=cfg.single_buffer),   # b1
            _spec((H, H), lambda i: (0, 0), single_buffer=cfg.single_buffer),   # W2^T
            _spec((1, H), lambda i: (0, 0), single_buffer=cfg.single_buffer),   # b2
        ]
        out_specs = pl.BlockSpec((bb, H), lambda i: (i, 0))
        scratch_shapes = []
        dim_sem = ("parallel",)
        weight_bytes = 2 * H * H * wb                 # read from HBM once
    else:
        grid = (nb, H // bk)
        kernel = functools.partial(_resblock_kernel_streamed,
                                   acc_in_out=cfg.acc_in_out, cast_x=cfg.cast_x)
        in_specs = [
            _spec((bb, H), lambda i, k: (i, 0)),                                # x
            _spec((H, bk), lambda i, k: (0, k)),                                # W1^T slab
            _spec((1, bk), lambda i, k: (0, k)),                                # b1 chunk
            _spec((bk, H), lambda i, k: (k, 0)),                                # W2^T slab
            _spec((1, H), lambda i, k: (0, 0), single_buffer=cfg.single_buffer),  # b2
        ]
        out_specs = pl.BlockSpec((bb, H), lambda i, k: (i, 0))
        scratch_shapes = []
        if cfg.cast_x:
            scratch_shapes.append(pltpu.VMEM((bb, H), w1_t.dtype))   # cast-once x
        if not cfg.acc_in_out:
            scratch_shapes.append(pltpu.VMEM((bb, H), jnp.float32))  # f32 accumulator
        dim_sem = ("parallel", "arbitrary")
        weight_bytes = nb * 2 * H * H * wb            # re-streamed per batch tile

    cost = pl.CostEstimate(
        flops=4 * B_pad * H * H,
        transcendentals=0,
        bytes_accessed=int(2 * B_pad * H * xb + weight_bytes + 2 * H * 4),
    )

    out = pl.pallas_call(
        kernel,
        out_shape=jax.ShapeDtypeStruct((B_pad, H), x.dtype),
        grid_spec=pltpu.PrefetchScalarGridSpec(
            num_scalar_prefetch=0,
            grid=grid,
            in_specs=in_specs,
            out_specs=out_specs,
            scratch_shapes=scratch_shapes,
        ),
        compiler_params=pltpu.CompilerParams(
            dimension_semantics=dim_sem,
            vmem_limit_bytes=cfg.vmem_limit,
        ),
        cost_estimate=cost,
    )(x_in, w1_t, b1_2d, w2_t, b2_2d)

    return out if B_pad == B else out[:B]


def residual_block(x, w1_t, b1_2d, w2_t, b2_2d, *, block_batch=None, block_k=None):
    """ResidualBlock forward: relu(fc2(relu(fc1(x))) + x).

    x: (B, H); w1_t/w2_t: (H, H) pre-transposed (in, out); b*_2d: (1, H) f32
    (see prepare_resblock_params).  block_batch/block_k override auto-tiling.
    """
    assert x.ndim == 2 and w1_t.shape == (x.shape[1], x.shape[1])
    B, H = x.shape
    cfg = _choose_config(B, H, x.dtype, w1_t.dtype, x.dtype, block_batch, block_k)
    return _residual_block_impl(x, w1_t, b1_2d, w2_t, b2_2d, cfg=cfg)


# ----------------------------------------------------------------------------
# Reference & self-test
# ----------------------------------------------------------------------------
def _init_linear_params(key, in_dim, out_dim, dtype=jnp.float32):
    # Mimic nn.Linear default init: U(-1/sqrt(in), 1/sqrt(in)).
    kw, kb = jax.random.split(key)
    bound = 1.0 / (in_dim ** 0.5)
    w = jax.random.uniform(kw, (out_dim, in_dim), dtype, -bound, bound)
    b = jax.random.uniform(kb, (out_dim,), dtype, -bound, bound)
    return w, b


def _reference(x, w1, b1, w2, b2):
    h = jnp.maximum(x @ w1.T + b1, 0.0)
    y = h @ w2.T + b2
    return jnp.maximum(y + x, 0.0)


if __name__ == "__main__":
    key = jax.random.PRNGKey(0)
    kx, k1, k2 = jax.random.split(key, 3)

    # Small shapes consistent with the module's forward: (batch, hidden).
    batch, hidden = 8, 32
    x = jax.random.normal(kx, (batch, hidden), jnp.float32)
    w1, b1 = _init_linear_params(k1, hidden, hidden)
    w2, b2 = _init_linear_params(k2, hidden, hidden)
    ref = _reference(x, w1, b1, w2, b2)

    # 1) f32 weights (exact module semantics), resident-weights path.
    p_f32 = prepare_resblock_params(w1, b1, w2, b2)
    out = jax.block_until_ready(residual_block(x, *p_f32))
    assert out.shape == (batch, hidden) and out.dtype == x.dtype
    assert jnp.allclose(out, ref, atol=1e-5, rtol=1e-5), "f32 resident mismatch"

    # 2) bf16 weights (MXU-native fast path; f32 accumulation / residual).
    p_bf16 = prepare_resblock_params(w1, b1, w2, b2, matmul_dtype=jnp.bfloat16)
    out_bf16 = jax.block_until_ready(residual_block(x, *p_bf16))
    assert jnp.allclose(out_bf16, ref, atol=5e-2, rtol=5e-2), "bf16 resident mismatch"

    # 3) Larger shape: multiple MXU-aligned batch tiles (grid > 1), still resident.
    B2, H2 = 1024, 256
    x2 = jax.random.normal(kx, (B2, H2), jnp.float32)
    w1b, b1b = _init_linear_params(k1, H2, H2)
    w2b, b2b = _init_linear_params(k2, H2, H2)
    ref2 = _reference(x2, w1b, b1b, w2b, b2b)
    p2_f32 = prepare_resblock_params(w1b, b1b, w2b, b2b)
    out2 = jax.block_until_ready(residual_block(x2, *p2_f32))
    assert jnp.allclose(out2, ref2, atol=1e-4, rtol=1e-4), "tiled resident mismatch"

    # 4) Non-multiple batch -> zero-padding path (600 pads to 768, 3 tiles).
    x3 = x2[:600]
    out3 = jax.block_until_ready(residual_block(x3, *p2_f32))
    assert out3.shape == (600, H2)
    assert jnp.allclose(out3, ref2[:600], atol=1e-4, rtol=1e-4), "padded-batch mismatch"

    # 5) k-streamed path (forced via block_k; f32 output accumulates in o_ref).
    out4 = jax.block_until_ready(residual_block(x2, *p2_f32, block_k=128))
    assert jnp.allclose(out4, ref2, atol=1e-4, rtol=1e-4), "streamed f32 mismatch"

    # 6) k-streamed + bf16 weights (exercises the cast-once x scratch).
    p2_bf16 = prepare_resblock_params(w1b, b1b, w2b, b2b, matmul_dtype=jnp.bfloat16)
    out5 = jax.block_until_ready(residual_block(x2, *p2_bf16, block_k=128))
    assert jnp.allclose(out5, ref2, atol=5e-2, rtol=5e-2), "streamed bf16 mismatch"

    # 7) bf16 activations + bf16 weights, streamed (f32 accumulator scratch path).
    x2_bf16 = x2.astype(jnp.bfloat16)
    ref6 = _reference(x2_bf16.astype(jnp.float32), w1b, b1b, w2b, b2b)
    out6 = jax.block_until_ready(residual_block(x2_bf16, *p2_bf16, block_k=128))
    assert out6.dtype == jnp.bfloat16
    assert jnp.allclose(out6.astype(jnp.float32), ref6, atol=1e-1, rtol=1e-1), \
        "streamed bf16-activation mismatch"

    print("KERNEL_OK")
</pallas_src>

<mosaic_0001>
module attributes {stable_mosaic.version = 11 : i64} {
  func.func @_probe_kernel(%arg0: i32, %arg1: memref<8x128xf32, #tpu.memory_space<vmem>>, %arg2: memref<1x128xf32, #tpu.memory_space<vmem>>, %arg3: memref<8x128xf32, #tpu.memory_space<vmem>>) attributes {dimension_semantics = [#tpu.dimension_semantics<arbitrary>], iteration_bounds = array<i64: 2>, scalar_prefetch = 0 : i64, scratch_operands = 0 : i64, tpu.core_type = #tpu.core_type<tc>, window_params = [{pipeline_mode = #tpu.pipeline_mode<synchronous>, transform_indices = @transform_0, window_bounds = array<i64: 8, 128>}, {pipeline_mode = #tpu.pipeline_mode<synchronous>, transform_indices = @transform_1, window_bounds = array<i64: 1, 128>}, {pipeline_mode = #tpu.pipeline_mode<synchronous>, transform_indices = @transform_2, window_bounds = array<i64: 8, 128>}]} {
    %c0 = arith.constant 0 : index
    %c0_0 = arith.constant 0 : index
    %0 = vector.load %arg1[%c0, %c0_0] : memref<8x128xf32, #tpu.memory_space<vmem>>, vector<8x128xf32>
    %c0_1 = arith.constant 0 : index
    %c0_2 = arith.constant 0 : index
    %1 = vector.load %arg2[%c0_1, %c0_2] : memref<1x128xf32, #tpu.memory_space<vmem>>, vector<1x128xf32>
    %2 = vector.broadcast %1 : vector<1x128xf32> to vector<8x128xf32>
    %3 = arith.addf %0, %2 : vector<8x128xf32>
    %c0_3 = arith.constant 0 : index
    %c0_4 = arith.constant 0 : index
    %4 = vector.load %arg3[%c0_3, %c0_4] : memref<8x128xf32, #tpu.memory_space<vmem>>, vector<8x128xf32>
    tpu.vector_store %arg3[%c0_3, %c0_4], %3 {strides = array<i32>} : memref<8x128xf32, #tpu.memory_space<vmem>>, vector<8x128xf32>,
    return
  }
  func.func @transform_0(%arg0: i32) -> (i32, i32) {
    %c0_i32 = arith.constant 0 : i32
    %c0_i32_0 = arith.constant 0 : i32
    %c0_i32_1 = arith.constant 0 : i32
    return %c0_i32, %c0_i32_0 : i32, i32
  }
  func.func @transform_1(%arg0: i32) -> (i32, i32) {
    %c0_i32 = arith.constant 0 : i32
    %c0_i32_0 = arith.constant 0 : i32
    %c0_i32_1 = arith.constant 0 : i32
    return %c0_i32, %c0_i32_0 : i32, i32
  }
  func.func @transform_2(%arg0: i32) -> (i32, i32) {
    %c0_i32 = arith.constant 0 : i32
    %c0_i32_0 = arith.constant 0 : i32
    %c0_i32_1 = arith.constant 0 : i32
    return %c0_i32, %c0_i32_0 : i32, i32
  }
}

module attributes {stable_mosaic.version = 11 : i64} {
  func.func @_resblock_kernel_resident(%arg0: i32, %arg1: memref<8x32xf32, #tpu.memory_space<vmem>>, %arg2: memref<32x32xf32, #tpu.memory_space<vmem>>, %arg3: memref<1x32xf32, #tpu.memory_space<vmem>>, %arg4: memref<32x32xf32, #tpu.memory_space<vmem>>, %arg5: memref<1x32xf32, #tpu.memory_space<vmem>>, %arg6: memref<8x32xf32, #tpu.memory_space<vmem>>) attributes {dimension_semantics = [#tpu.dimension_semantics<parallel>], iteration_bounds = array<i64: 1>, scalar_prefetch = 0 : i64, scratch_operands = 0 : i64, tpu.core_type = #tpu.core_type<tc>, window_params = [{transform_indices = @transform_0, window_bounds = array<i64: 8, 32>}, {pipeline_mode = #tpu.pipeline_mode<synchronous>, transform_indices = @transform_1, window_bounds = array<i64: 32, 32>}, {pipeline_mode = #tpu.pipeline_mode<synchronous>, transform_indices = @transform_2, window_bounds = array<i64: 1, 32>}, {pipeline_mode = #tpu.pipeline_mode<synchronous>, transform_indices = @transform_3, window_bounds = array<i64: 32, 32>}, {pipeline_mode = #tpu.pipeline_mode<synchronous>, transform_indices = @transform_4, window_bounds = array<i64: 1, 32>}, {transform_indices = @transform_5, window_bounds = array<i64: 8, 32>}]} {
    %c0 = arith.constant 0 : index
    %c0_0 = arith.constant 0 : index
    %0 = vector.load %arg1[%c0, %c0_0] : memref<8x32xf32, #tpu.memory_space<vmem>>, vector<8x32xf32>
    %c0_1 = arith.constant 0 : index
    %c0_2 = arith.constant 0 : index
    %1 = vector.load %arg2[%c0_1, %c0_2] : memref<32x32xf32, #tpu.memory_space<vmem>>, vector<32x32xf32>
    %cst = arith.constant dense<0.000000e+00> : vector<8x32xf32>
    %2 = tpu.matmul %0, %1, %cst {dimension_numbers = #tpu.dot_dimension_numbers<[1], [0], [0], [1], [0, 0, 1, 1], [], []>} : vector<8x32xf32>, vector<32x32xf32>, vector<8x32xf32> -> vector<8x32xf32>
    %c0_3 = arith.constant 0 : index
    %c0_4 = arith.constant 0 : index
    %3 = vector.load %arg3[%c0_3, %c0_4] : memref<1x32xf32, #tpu.memory_space<vmem>>, vector<1x32xf32>
    %4 = vector.broadcast %3 : vector<1x32xf32> to vector<8x32xf32>
    %5 = arith.addf %2, %4 : vector<8x32xf32>
    %cst_5 = arith.constant 0.000000e+00 : f32
    %6 = vector.broadcast %cst_5 : f32 to vector<8x32xf32>
    %7 = arith.maximumf %5, %6 : vector<8x32xf32>
    %c0_6 = arith.constant 0 : index
    %c0_7 = arith.constant 0 : index
    %8 = vector.load %arg4[%c0_6, %c0_7] : memref<32x32xf32, #tpu.memory_space<vmem>>, vector<32x32xf32>
    %cst_8 = arith.constant dense<0.000000e+00> : vector<8x32xf32>
    %9 = tpu.matmul %7, %8, %cst_8 {dimension_numbers = #tpu.dot_dimension_numbers<[1], [0], [0], [1], [0, 0, 1, 1], [], []>} : vector<8x32xf32>, vector<32x32xf32>, vector<8x32xf32> -> vector<8x32xf32>
    %c0_9 = arith.constant 0 : index
    %c0_10 = arith.constant 0 : index
    %10 = vector.load %arg5[%c0_9, %c0_10] : memref<1x32xf32, #tpu.memory_space<vmem>>, vector<1x32xf32>
    %11 = vector.broadcast %10 : vector<1x32xf32> to vector<8x32xf32>
    %12 = arith.addf %9, %11 : vector<8x32xf32>
    %13 = arith.addf %12, %0 : vector<8x32xf32>
    %cst_11 = arith.constant 0.000000e+00 : f32
    %14 = vector.broadcast %cst_11 : f32 to vector<8x32xf32>
    %15 = arith.maximumf %13, %14 : vector<8x32xf32>
    %c0_12 = arith.constant 0 : index
    %c0_13 = arith.constant 0 : index
    %16 = vector.load %arg6[%c0_12, %c0_13] : memref<8x32xf32, #tpu.memory_space<vmem>>, vector<8x32xf32>
    tpu.vector_store %arg6[%c0_12, %c0_13], %15 {strides = array<i32>} : memref<8x32xf32, #tpu.memory_space<vmem>>, vector<8x32xf32>,
    return
  }
  func.func @transform_0(%arg0: i32) -> (i32, i32) {
    %c0_i32 = arith.constant 0 : i32
    %c0_i32_0 = arith.constant 0 : i32
    return %arg0, %c0_i32 : i32, i32
  }
  func.func @transform_1(%arg0: i32) -> (i32, i32) {
    %c0_i32 = arith.constant 0 : i32
    %c0_i32_0 = arith.constant 0 : i32
    %c0_i32_1 = arith.constant 0 : i32
    return %c0_i32, %c0_i32_0 : i32, i32
  }
  func.func @transform_2(%arg0: i32) -> (i32, i32) {
    %c0_i32 = arith.constant 0 : i32
    %c0_i32_0 = arith.constant 0 : i32
    %c0_i32_1 = arith.constant 0 : i32
    return %c0_i32, %c0_i32_0 : i32, i32
  }
  func.func @transform_3(%arg0: i32) -> (i32, i32) {
    %c0_i32 = arith.constant 0 : i32
    %c0_i32_0 = arith.constant 0 : i32
    %c0_i32_1 = arith.constant 0 : i32
    return %c0_i32, %c0_i32_0 : i32, i32
  }
  func.func @transform_4(%arg0: i32) -> (i32, i32) {
    %c0_i32 = arith.constant 0 : i32
    %c0_i32_0 = arith.constant 0 : i32
    %c0_i32_1 = arith.constant 0 : i32
    return %c0_i32, %c0_i32_0 : i32, i32
  }
  func.func @transform_5(%arg0: i32) -> (i32, i32) {
    %c0_i32 = arith.constant 0 : i32
    %c0_i32_0 = arith.constant 0 : i32
    return %arg0, %c0_i32 : i32, i32
  }
}

</mosaic_0001>

<bundles_post_ra>
// kernel: tpu_custom_call.1
= control target key start
LH: loop header
LB: loop body
LE: loop exit
PB: predicated region body
PF: predicated region fallthrough
CT: control target
= control target key end

     0   :  { %7 = vsyncpa [#allocation3], 0  ;;  %s348_s0 = inlined_call_operand.hbm [shape: f32[8,128], index: 0, kind: input, shape index: {}]   ;;  %s349_s1 = inlined_call_operand.vmem [shape: f32[1,128], index: 1, kind: input, shape index: {}]   ;;  %s350_s2 = inlined_call_operand.hbm [shape: f32[8,128], index: 2, kind: output, shape index: {}]  }
   0x1   :  { %8 = vsyncpa [#allocation4], 0  ;;  %s298_s9 = smov 0  }
   0x2 LB: > { %s179_s10 = sadd.s32 4294967295, %s279_s9   ;;  %p180_p0 = scmp.ge.s32.totalorder %s279_s9, 1  ;;  %s279_s9 = sphi %s298_s9, %s14_s9  }
   0x3   : > { %p82_p1 = scmp.lt.s32.totalorder %s279_s9, 3  ;;  %p310_p3 = scmp.eq.s32.totalorder %s179_s10, 0 }
   0x4   : > { %s281_s13 = smov [#allocation2]  }
   0x5   : > { %p306_p2 = pnand %p180_p0, %p82_p1  ;;  %s95_s14 = sshll.u32 %s281_s13, 4  ;;  %s96_s14 = int_to_ptr.vmem [resolvable:$true] %s95_s14 }
   0x6   : > { %s226_s15 = scalar_lea.vmem %s96_s14, 128  ;;  %p234_p10 = scmp.lt.s32.totalorder %s96_s14, %s96_s14 }
   0x7   : > { %p197_p4 = pneg %p306_p2  ;;  %p227_p7 = scmp.ne.s32.totalorder %s96_s14, %s226_s15 }
   0x8   : > { %p235_p11 = scmp.lt.s32.totalorder %s226_s15, %s226_s15 }
   0x9   : > { %p198_p5 = pnand %p310_p3, %p197_p4 }
   0xa   : > { %p236_p12 = por %p235_p11, %p234_p10 }
   0xb   : > { %p217_p6 = pneg %p198_p5 }
   0xd   : > { %p229_p8 = pnand %p227_p7, %p217_p6 }
   0xf   : > { %p230_p9 = pneg %p229_p8 }
  0x11   : > { %p237_p13 = pnand %p236_p12, %p230_p9 }
  0x13   : > { %240 = shalt.err (!%p237_p13)
}
  0x14   : > { %200 = dma.hbm_to_vmem [thread:$0]  (!%p198_p5), %s348_s0, 128, %s96_s14, [#allocation3]  }
  0x15   : > { %111 = sbr.rel (%p306_p2) target bundleno = 42 (0x2a), region = 28 }
  0x1a   : > { %270 = dma.done.wait (%p310_p3), [#allocation3], 128  }
  0x1b   : > { %272 = vsyncadd (%p310_p3), [#allocation3], 4294967168  ;;  %s282_s18 = smov [#allocation5]   ;;  %v123_v0 = vld [vmem:[#allocation2] sm:$0xff]  ;;  %p330_p0 = scmp.eq.s32.totalorder %s179_s10, 1 }
  0x1c   : > { %s140_s19 = sshll.u32 %s282_s18, 4  ;;  %v184_v1 = vld [vmem:[%s349_s1] ss:$0 sm:$0xff]  ;;  %s141_s19 = int_to_ptr.vmem [resolvable:$true] %s140_s19 }
  0x1d   : > { %v131_v2 = vadd.f32 %v184_v1, %v123_v0  ;;  %s241_s23 = scalar_lea.vmem %s141_s19, 128  ;;  %p248_p4 = scmp.lt.s32.totalorder %s141_s19, %s141_s19 }
  0x1e   : > { %p242_p1 = scmp.ne.s32.totalorder %s141_s19, %s241_s23  ;;  %p249_p5 = scmp.lt.s32.totalorder %s241_s23, %s241_s23 }
  0x1f   : > { %132 = vst [vmem:[#allocation5] sm:$0xff] %v131_v2 }
  0x20   : > { %p243_p2 = pnand %p242_p1, %p330_p0  ;;  %p250_p6 = por %p249_p5, %p248_p4 }
  0x22   : > { %p244_p3 = pneg %p243_p2 }
  0x24   : > { %p251_p7 = pnand %p250_p6, %p244_p3 }
  0x26   : > { %254 = shalt.err (!%p251_p7)
}
  0x27   : > { %194 = dma.vmem_to_hbm [thread:$0]  (%p330_p0), %s141_s19, 128, %s350_s2, [#allocation4]  }
  0x28   : > { %274 = dma.done.wait (%p330_p0), [#allocation4], 128  }
  0x29   : > { %276 = vsyncadd (%p330_p0), [#allocation4], 4294967168 }
  0x2a PF: > { %s14_s9 = sadd.s32 1, %s279_s9  }
  0x2b   : > { %p11_p8 = scmp.ge.s32.totalorder %s14_s9, 4  }
  0x2d   :  { %13 = sbr.rel (!%p11_p8) target bundleno = 2 (0x2), region = 57 }
  0x32   :  { %153 = vsyncpa [#allocation3], 1 }
  0x33   :  { %155 = vsyncpa [#allocation3 + $0x1], 1 }
  0x34   :  { %156 = vsyncpa [#allocation4], 1 }
  0x35   :  { %158 = vsyncpa [#allocation4 + $0x1], 1 }

// kernel: _residual_block_impl.1
= control target key start
LH: loop header
LB: loop body
LE: loop exit
PB: predicated region body
PF: predicated region fallthrough
CT: control target
= control target key end

     0   :  { %10 = vsyncpa [#allocation3], 0  ;;  %s439_s0 = inlined_call_operand.hbm [shape: f32[8,32], index: 0, kind: input, shape index: {}]   ;;  %s440_s1 = inlined_call_operand.hbm [shape: f32[32,32], index: 1, kind: input, shape index: {}]   ;;  %s441_s2 = inlined_call_operand.vmem [shape: f32[1,32], index: 2, kind: input, shape index: {}]   ;;  %s442_s3 = inlined_call_operand.hbm [shape: f32[32,32], index: 3, kind: input, shape index: {}]   ;;  %s443_s4 = inlined_call_operand.vmem [shape: f32[1,32], index: 4, kind: input, shape index: {}]   ;;  %s444_s5 = inlined_call_operand.hbm [shape: f32[8,32], index: 5, kind: output, shape index: {}]  }
   0x1   :  { %11 = vsyncpa [#allocation6], 0 }
   0x2   :  { %12 = vsyncpa [#allocation4], 0  ;;  %s380_s18 = smov [#allocation5]  }
   0x3   :  { %s28_s19 = sshll.u32 %s380_s18, 4  ;;  %s29_s19 = int_to_ptr.vmem [resolvable:$true] %s28_s19 }
   0x4   :  { %s302_s20 = scalar_lea.vmem %s29_s19, 512  ;;  %p307_p1 = scmp.lt.s32.totalorder %s29_s19, %s29_s19 }
   0x5   :  { %p303_p0 = scmp.ne.s32.totalorder %s29_s19, %s302_s20  ;;  %p308_p2 = scmp.lt.s32.totalorder %s302_s20, %s302_s20 }
   0x7   :  { %p309_p3 = por %p308_p2, %p307_p1 }
   0x9   :  { %p310_p4 = pnand %p309_p3, %p303_p0 }
   0xb   :  { %313 = shalt.err (!%p310_p4)
}
   0xc   :  { %s381_s21 = smov 128   ;;  %s382_s22 = smov 8  }
   0xd   :  { %34 = dma.hbm_to_vmem [thread:$0]  %s440_s1, 512, %s29_s19, [#allocation6], %s381_s21, %s381_s21, %s382_s22  }
   0xe   :  { %s383_s25 = smov [#allocation2]   ;;  %s384_s27 = smov [#allocation7]  }
   0xf   :  { %s19_s26 = sshll.u32 %s383_s25, 4  ;;  %s42_s28 = sshll.u32 %s384_s27, 4  ;;  %s20_s26 = int_to_ptr.vmem [resolvable:$true] %s19_s26  ;;  %s43_s28 = int_to_ptr.vmem [resolvable:$true] %s42_s28 }
  0x10   :  { %s322_s29 = scalar_lea.vmem %s20_s26, 128  ;;  %p327_p6 = scmp.lt.s32.totalorder %s20_s26, %s20_s26 }
  0x11   :  { %p323_p5 = scmp.ne.s32.totalorder %s20_s26, %s322_s29  ;;  %p328_p7 = scmp.lt.s32.totalorder %s322_s29, %s322_s29 }
  0x13   :  { %p329_p8 = por %p328_p7, %p327_p6 }
  0x15   :  { %p330_p9 = pnand %p329_p8, %p323_p5 }
  0x17   :  { %333 = shalt.err (!%p330_p9)
}
  0x18   :  { %22 = dma.hbm_to_vmem [thread:$0]  %s439_s0, 128, %s20_s26, [#allocation3]  }
  0x19   :  { %s342_s7 = scalar_lea.vmem %s43_s28, 512  ;;  %p347_p11 = scmp.lt.s32.totalorder %s43_s28, %s43_s28 }
  0x1a   :  { %p343_p10 = scmp.ne.s32.totalorder %s43_s28, %s342_s7  ;;  %p348_p12 = scmp.lt.s32.totalorder %s342_s7, %s342_s7 }
  0x1c   :  { %p349_p13 = por %p348_p12, %p347_p11 }
  0x1e   :  { %p350_p0 = pnand %p349_p13, %p343_p10 }
  0x20   :  { %353 = shalt.err (!%p350_p0)
}
  0x21   :  { %48 = dma.hbm_to_vmem [thread:$0]  %s442_s3, 512, %s43_s28, [#allocation6], %s381_s21, %s381_s21, %s382_s22  }
  0x22   :  { %374 = dma.done.wait [#allocation3], 128  }
  0x23   :  { %375 = vsyncadd [#allocation3], 4294967168 }
  0x24   :  { %376 = dma.done.wait [#allocation6], 1024  }
  0x25   :  { %377 = vsyncadd [#allocation6], 4294966272  ;;  %v385_v0 = vmov 0.0   ;;  %vm386_vm0 = vmmov 0   ;;  %v64_v1 = vld [vmem:[#allocation5 + $0x18] sm:$0xff]  ;;  %v63_v2 = vld [vmem:[#allocation5 + $0x10] sm:$0xff] }
  0x26   :  { %264 = vmatprep.subr.mxu0 %v385_v0  ;;  %272 = vmatprep.mubr.msk.f32.mxu0 %vm386_vm0, %v385_v0  ;;  %v150_v3 = vld [vmem:[#allocation7 + $0x18] sm:$0xff]  ;;  %v62_v4 = vld [vmem:[#allocation5 + $0x8] sm:$0xff]  ;;  %v61_v5 = vld [vmem:[#allocation5] sm:$0xff]  ;;  %vm72_vm1 = vcmask 261120   ;;  %s387_s11 = smov [#allocation8]  }
  0x27   :  { %275 = vmatprep.subr.mxu1 %v385_v0  ;;  %283 = vmatprep.mubr.msk.f32.mxu1 %vm386_vm0, %v385_v0  ;;  %v60_v6 = vld [vmem:[#allocation2] sm:$0xff]  ;;  %v149_v7 = vld [vmem:[#allocation7 + $0x10] sm:$0xff]  ;;  %v148_v8 = vld [vmem:[#allocation7 + $0x8] sm:$0xff]  ;;  %s240_s12 = sshll.u32 %s387_s11, 4  ;;  %s241_s12 = int_to_ptr.vmem [resolvable:$true] %s240_s12 }
  0x28   :  { %265 = vmatpush3.msra.mxu0 %v64_v1  ;;  %276 = vmatpush3.msra.mxu1 %v150_v3  ;;  %v147_v9 = vld [vmem:[#allocation7] sm:$0xff]  ;;  %v250_v10 = vld [vmem:[%s441_s2] ss:$0 sm:$0xff]  ;;  %s354_s2 = scalar_lea.vmem %s241_s12, 128  ;;  %p359_p2 = scmp.lt.s32.totalorder %s241_s12, %s241_s12 }
  0x29   :  { %266 = vmatprep.subr.mxu0 %v385_v0  ;;  %277 = vmatprep.subr.mxu1 %v385_v0  ;;  %v252_v15 = vld [vmem:[%s443_s4] ss:$0 sm:$0xff]  ;;  %p355_p1 = scmp.ne.s32.totalorder %s241_s12, %s354_s2  ;;  %p360_p3 = scmp.lt.s32.totalorder %s354_s2, %s354_s2 }
  0x2a   :  { %267 = vmatpush3.msra.mxu0 %v63_v2  ;;  %278 = vmatpush3.msra.mxu1 %v149_v7 }
  0x2b   :  { %268 = vmatprep.subr.mxu0 %v385_v0  ;;  %279 = vmatprep.subr.mxu1 %v385_v0  ;;  %p361_p4 = por %p360_p3, %p359_p2 }
  0x2c   :  { %269 = vmatpush3.msra.mxu0 %v62_v4  ;;  %280 = vmatpush3.msra.mxu1 %v148_v8 }
  0x2d   :  { %270 = vmatprep.subr.mxu0 %v385_v0  ;;  %281 = vmatprep.subr.mxu1 %v385_v0  ;;  %p362_p5 = pnand %p361_p4, %p355_p1 }
  0x2e   :  { %271 = vmatpush3.msra.mxu0 %v61_v5  ;;  %282 = vmatpush3.msra.mxu1 %v147_v9 }
  0x2f   :  { %273 = vmatmul.mubr.msk.f32.vlgmr.msra.gmra.mxu0 %vm72_vm1, %v60_v6 }
  0xef   :  { %v142_v11 = vpop.f32.mrf.mxu0 }
  0xf0   :  { %v143_v12 = vadd.f32 %v250_v10, %v142_v11 }
  0xf1   :  { %v274_v13 = vpop.f32.mrf.mxu0 }
  0xf2   :  { %v146_v14 = vmax.f32 %v143_v12, 0.0 }
  0xf4   :  { %284 = vmatmul.mubr.msk.f32.vlgmr.msra.gmra.mxu1 %vm72_vm1, %v146_v14 }
 0x1b4   :  { %v227_v16 = vpop.f32.mrf.mxu1 }
 0x1b5   :  { %v228_v17 = vadd.f32 %v252_v15, %v227_v16 }
 0x1b6   :  { %v285_v18 = vpop.f32.mrf.mxu1 }
 0x1b7   :  { %v231_v19 = vadd.f32 %v228_v17, %v60_v6 }
 0x1b9   :  { %v232_v20 = vmax.f32 %v231_v19, 0.0 }
 0x1bb   :  { %233 = vst.msk [vmem:[#allocation8] sm:$0xff] %vm72_vm1, %v232_v20 }
 0x1bc   :  { %365 = shalt.err (!%p362_p5)
}
 0x1bd   :  { %243 = dma.vmem_to_hbm [thread:$0]  %s241_s12, 128, %s444_s5, [#allocation4]  }
 0x1be   :  { %378 = dma.done.wait [#allocation4], 128  }
 0x1bf   :  { %379 = vsyncadd [#allocation4], 4294967168 }
 0x1c0   :  { %247 = vsyncpa [#allocation3], 1 }
 0x1c1   :  { %248 = vsyncpa [#allocation6], 1 }
 0x1c2   :  { %249 = vsyncpa [#allocation4], 1 }

</bundles_post_ra>
